<compile_context>
chip_gen: v7x
topology: tpu7x:2x2x1
jax: 0.10.0
libtpu: 0.0.40
codegen_flags: <defaults>
</compile_context>

<pallas_src>
import functools

import jax
import jax.numpy as jnp
from jax.experimental import pallas as pl
from jax.experimental.pallas import tpu as pltpu

_LANES = 128


def _cox_nll_sorted_kernel(data_ref, loss_ref, *, n_real):
    """data_ref: (2, R, 128) f32 VMEM.
         data_ref[0] = pred sorted by ascending event time, row-major
         data_ref[1] = event indicators sorted the same way
       loss_ref: (1, 1) f32 SMEM scalar output."""
    _, n_rows, n_lanes = data_ref.shape

    pred = data_ref[0]     # (R, 128), sublane-dense
    event = data_ref[1]    # (R, 128)

    row = jax.lax.broadcasted_iota(jnp.int32, (n_rows, n_lanes), 0)
    col = jax.lax.broadcasted_iota(jnp.int32, (n_rows, n_lanes), 1)
    valid = (row * n_lanes + col) < n_real

    # Numerically stable global max shift.  Every risk set contains its own
    # sample, so the shifted denominator is >= exp(pred_i - m) > 0.
    neg_big = jnp.float32(-3.0e38)
    m = jnp.max(jnp.where(valid, pred, neg_big))
    e = jnp.where(valid, jnp.exp(pred - m), jnp.float32(0.0))   # (R, 128)

    # ---- two-level blocked suffix sum:  s[i] = sum_{j >= i} e[j] ----------
    # Level 1: inclusive suffix sum within each 128-lane row via one
    # (128, 128) triangular matmul on the otherwise-idle MXU.
    ci = jax.lax.broadcasted_iota(jnp.int32, (n_lanes, n_lanes), 0)
    cj = jax.lax.broadcasted_iota(jnp.int32, (n_lanes, n_lanes), 1)
    tri = (ci >= cj).astype(jnp.float32)            # tri[c', c] = [c' >= c]
    srow = jnp.dot(e, tri, preferred_element_type=jnp.float32,
                   precision=jax.lax.Precision.HIGHEST)          # (R, 128)

    # Level 2: exclusive suffix over the R row totals, broadcast-added back.
    # (Statically skipped when everything fits in a single 128-lane row.)
    if n_rows > 1:
        row_tot = jnp.sum(e, axis=1, keepdims=True)              # (R, 1)
        ri = jax.lax.broadcasted_iota(jnp.int32, (n_rows, n_rows), 0)
        rj = jax.lax.broadcasted_iota(jnp.int32, (n_rows, n_rows), 1)
        strict = (rj > ri).astype(jnp.float32)                   # [r' > r]
        off = jnp.dot(strict, row_tot, preferred_element_type=jnp.float32,
                      precision=jax.lax.Precision.HIGHEST)       # (R, 1)
        s = srow + off
    else:
        s = srow

    # Guard padded lanes BEFORE the log so no -inf / NaN is ever produced.
    log_denom = jnp.log(jnp.where(valid, s, jnp.float32(1.0))) + m
    pll = jnp.where(valid, pred - log_denom, jnp.float32(0.0))
    ev = jnp.where(valid, event, jnp.float32(0.0))

    n_events = jnp.sum(ev)
    neg_sum = -jnp.sum(ev * pll)
    # reduction='mean' over event samples; returns 0.0 when there are no
    # events (torchsurv would produce NaN here).
    loss_ref[0, 0] = jnp.where(
        n_events > jnp.float32(0.0),
        neg_sum / jnp.maximum(n_events, jnp.float32(1.0)),
        jnp.float32(0.0),
    )


def cox_neg_partial_log_likelihood(event, time, pred):
    """Pallas equivalent of custom_loss.forward(event, time, pred)."""
    n = pred.shape[0]
    n_pad = ((n + _LANES - 1) // _LANES) * _LANES
    n_pad = max(_LANES, n_pad)
    r_rows = n_pad // _LANES
    pad = n_pad - n

    # Sort by ascending time (stable, O(N log N)); the risk set of a sample
    # then becomes the suffix of the sorted order.  Preprocessing is fused
    # into a single gather chain: stack -> gather -> pad -> reshape.
    order = jnp.argsort(time, stable=True)
    data = jnp.stack(
        [pred.astype(jnp.float32), event.astype(jnp.float32)], axis=0
    )[:, order]                                                 # (2, n)
    data = jnp.pad(data, ((0, 0), (0, pad))).reshape(2, r_rows, _LANES)

    n_bytes_in = 2 * n_pad * 4
    # Derived VMEM need: double-buffered input + ~a dozen live (R,128) f32
    # temporaries + the (128,128) triangular constant.  Capped well below
    # v7x's 64 MiB physical VMEM; no artificial 16 MiB floor.
    vmem_need = 2 * n_bytes_in + 16 * n_pad * 4 + 2 * _LANES * _LANES * 4
    vmem_limit = int(min(max(vmem_need, 1 << 20), 16 * 1024 * 1024))

    cost = pl.CostEstimate(
        flops=int(2 * r_rows * _LANES * _LANES + 2 * r_rows * r_rows + 30 * n_pad),
        transcendentals=int(2 * n_pad),
        bytes_accessed=int(n_bytes_in + 4),
    )

    out = pl.pallas_call(
        functools.partial(_cox_nll_sorted_kernel, n_real=n),
        out_shape=jax.ShapeDtypeStruct((1, 1), jnp.float32),
        in_specs=[pl.BlockSpec(memory_space=pltpu.MemorySpace.VMEM)],
        out_specs=pl.BlockSpec(memory_space=pltpu.MemorySpace.SMEM),
        compiler_params=pltpu.CompilerParams(vmem_limit_bytes=vmem_limit),
        cost_estimate=cost,
    )(data)
    return out[0, 0]


def _reference_loss(event, time, pred):
    # pure-JAX reference using the sort + reverse cum-log-sum-exp formulation
    order = jnp.argsort(time, stable=True)
    p = pred[order].astype(jnp.float32)
    e = event[order].astype(jnp.float32)
    log_denom = jax.lax.cumlogsumexp(p[::-1])[::-1]
    pll = p - log_denom
    return -jnp.sum(e * pll) / jnp.sum(e)


if __name__ == "__main__":
    key = jax.random.PRNGKey(0)
    k1, k2, k3 = jax.random.split(key, 3)
    n = 16  # batch of survival samples

    pred = jax.random.normal(k1, (n,), dtype=jnp.float32)              # log hazards
    time = jax.random.uniform(k2, (n,), minval=1.0, maxval=100.0,
                              dtype=jnp.float32)                       # unique w.h.p.
    event = (jax.random.uniform(k3, (n,)) > 0.3).astype(jnp.float32)   # event indicators

    loss = cox_neg_partial_log_likelihood(event, time, pred)
    jax.block_until_ready(loss)

    ref = _reference_loss(event, time, pred)
    assert jnp.allclose(loss, ref, atol=1e-5, rtol=1e-4), (loss, ref)

    print("KERNEL_OK")
</pallas_src>

<mosaic_0001>
module attributes {stable_mosaic.version = 11 : i64} {
  func.func @_cox_nll_sorted_kernel(%arg0: memref<2x1x128xf32, #tpu.memory_space<vmem>>, %arg1: memref<1x1xf32, #tpu.memory_space<smem>>) attributes {dimension_semantics = [], scalar_prefetch = 0 : i64, scratch_operands = 0 : i64, tpu.core_type = #tpu.core_type<tc>} {
    %c0 = arith.constant 0 : index
    %c0_0 = arith.constant 0 : index
    %c0_1 = arith.constant 0 : index
    %0 = vector.load %arg0[%c0, %c0_0, %c0_1] : memref<2x1x128xf32, #tpu.memory_space<vmem>>, vector<1x1x128xf32>
    %1 = vector.shape_cast %0 : vector<1x1x128xf32> to vector<1x128xf32>
    %c1 = arith.constant 1 : index
    %c0_2 = arith.constant 0 : index
    %c0_3 = arith.constant 0 : index
    %2 = vector.load %arg0[%c1, %c0_2, %c0_3] : memref<2x1x128xf32, #tpu.memory_space<vmem>>, vector<1x1x128xf32>
    %3 = vector.shape_cast %2 : vector<1x1x128xf32> to vector<1x128xf32>
    %4 = tpu.iota {dimensions = array<i32: 0>} : vector<1x128xi32>
    %5 = tpu.iota {dimensions = array<i32: 1>} : vector<1x128xi32>
    %c128_i32 = arith.constant 128 : i32
    %6 = vector.broadcast %c128_i32 : i32 to vector<1x128xi32>
    %7 = arith.muli %4, %6 : vector<1x128xi32>
    %8 = arith.addi %7, %5 : vector<1x128xi32>
    %c16_i32 = arith.constant 16 : i32
    %9 = vector.broadcast %c16_i32 : i32 to vector<1x128xi32>
    %10 = arith.cmpi slt, %8, %9 : vector<1x128xi32>
    %cst = arith.constant -3.000000e+38 : f32
    %11 = vector.broadcast %cst : f32 to vector<1x128xf32>
    %12 = arith.select %10, %1, %11 : vector<1x128xi1>, vector<1x128xf32>
    %13 = vector.shape_cast %12 : vector<1x128xf32> to vector<1x1x128xf32>
    %cst_4 = arith.constant dense<0xFF800000> : vector<1xf32>
    %14 = vector.multi_reduction <maximumf>, %13, %cst_4 [1, 2] : vector<1x1x128xf32> to vector<1xf32>
    %15 = vector.shape_cast %14 : vector<1xf32> to vector<1x1x1xf32>
    %16 = vector.extract %15[0, 0, 0] : f32 from vector<1x1x1xf32>
    %17 = vector.broadcast %16 : f32 to vector<1x128xf32>
    %18 = arith.subf %1, %17 : vector<1x128xf32>
    %19 = math.exp %18 : vector<1x128xf32>
    %cst_5 = arith.constant 0.000000e+00 : f32
    %20 = vector.broadcast %cst_5 : f32 to vector<1x128xf32>
    %21 = arith.select %10, %19, %20 : vector<1x128xi1>, vector<1x128xf32>
    %22 = tpu.iota {dimensions = array<i32: 0>} : vector<128x128xi32>
    %23 = tpu.iota {dimensions = array<i32: 1>} : vector<128x128xi32>
    %24 = arith.cmpi sge, %22, %23 : vector<128x128xi32>
    %25 = arith.extui %24 : vector<128x128xi1> to vector<128x128xi32>
    %26 = arith.sitofp %25 : vector<128x128xi32> to vector<128x128xf32>
    %cst_6 = arith.constant dense<0.000000e+00> : vector<1x128xf32>
    %27 = tpu.matmul %21, %26, %cst_6 {dimension_numbers = #tpu.dot_dimension_numbers<[1], [0], [0], [1], [0, 0, 1, 1], [], []>, precision = #tpu.contract_precision<fp32>} : vector<1x128xf32>, vector<128x128xf32>, vector<1x128xf32> -> vector<1x128xf32>
    %cst_7 = arith.constant 1.000000e+00 : f32
    %28 = vector.broadcast %cst_7 : f32 to vector<1x128xf32>
    %29 = arith.select %10, %27, %28 : vector<1x128xi1>, vector<1x128xf32>
    %30 = math.log %29 : vector<1x128xf32>
    %31 = vector.broadcast %16 : f32 to vector<1x128xf32>
    %32 = arith.addf %30, %31 : vector<1x128xf32>
    %33 = arith.subf %1, %32 : vector<1x128xf32>
    %cst_8 = arith.constant 0.000000e+00 : f32
    %34 = vector.broadcast %cst_8 : f32 to vector<1x128xf32>
    %35 = arith.select %10, %33, %34 : vector<1x128xi1>, vector<1x128xf32>
    %cst_9 = arith.constant 0.000000e+00 : f32
    %36 = vector.broadcast %cst_9 : f32 to vector<1x128xf32>
    %37 = arith.select %10, %3, %36 : vector<1x128xi1>, vector<1x128xf32>
    %38 = vector.shape_cast %37 : vector<1x128xf32> to vector<1x1x128xf32>
    %cst_10 = arith.constant dense<0.000000e+00> : vector<1xf32>
    %39 = vector.multi_reduction <add>, %38, %cst_10 [1, 2] : vector<1x1x128xf32> to vector<1xf32>
    %40 = vector.shape_cast %39 : vector<1xf32> to vector<1x1x1xf32>
    %41 = vector.extract %40[0, 0, 0] : f32 from vector<1x1x1xf32>
    %42 = arith.mulf %37, %35 : vector<1x128xf32>
    %43 = vector.shape_cast %42 : vector<1x128xf32> to vector<1x1x128xf32>
    %cst_11 = arith.constant dense<0.000000e+00> : vector<1xf32>
    %44 = vector.multi_reduction <add>, %43, %cst_11 [1, 2] : vector<1x1x128xf32> to vector<1xf32>
    %45 = vector.shape_cast %44 : vector<1xf32> to vector<1x1x1xf32>
    %46 = vector.extract %45[0, 0, 0] : f32 from vector<1x1x1xf32>
    %cst_12 = arith.constant 0.000000e+00 : f32
    %47 = arith.subf %cst_12, %46 : f32
    %cst_13 = arith.constant 0.000000e+00 : f32
    %48 = arith.cmpf ogt, %41, %cst_13 : f32
    %cst_14 = arith.constant 1.000000e+00 : f32
    %49 = arith.maximumf %41, %cst_14 : f32
    %50 = arith.divf %47, %49 : f32
    %cst_15 = arith.constant 0.000000e+00 : f32
    %51 = arith.select %48, %50, %cst_15 : f32
    %c0_16 = arith.constant 0 : index
    %c0_17 = arith.constant 0 : index
    %52 = memref.load %arg1[%c0_16, %c0_17] : memref<1x1xf32, #tpu.memory_space<smem>>
    memref.store %51, %arg1[%c0_16, %c0_17] : memref<1x1xf32, #tpu.memory_space<smem>>
    return
  }
}

</mosaic_0001>

<bundles_post_ra>
// kernel: tpu_custom_call.1
= control target key start
LH: loop header
LB: loop body
LE: loop exit
PB: predicated region body
PF: predicated region fallthrough
CT: control target
= control target key end

     0   :  { %6 = vsyncpa [#allocation3], 0  ;;  %s1986_s0 = inlined_call_operand.hbm [shape: f32[2,1,128], index: 0, kind: input, shape index: {}]   ;;  %s1987_s1 = inlined_call_operand.hbm [shape: f32[1,1], index: 1, kind: output, shape index: {}]  }
   0x1   :  { %7 = vsyncpa [#allocation4], 0  ;;  %s1394_s6 = smov [#allocation2]   ;;  %s1358_s10 = scalar_lea.hbm %s1986_s0, 32 }
   0x2   :  { %s13_s7 = sshll.u32 %s1394_s6, 4  ;;  %p1359_p0 = scmp.ne.s32.totalorder %s1986_s0, %s1358_s10  ;;  %s14_s7 = int_to_ptr.vmem [resolvable:$true] %s13_s7 }
   0x3   :  { %p1362_p1 = scmp.lt.u32.totalorder %s1358_s10, %s1986_s0 }
   0x5   :  { %p1364_p2 = pnand %p1362_p1, %p1359_p0 }
   0x7   :  { %1367 = shalt.err (!%p1364_p2)
}
   0x8   :  { %s1368_s15 = scalar_lea.vmem %s14_s7, 32  ;;  %p1373_p4 = scmp.lt.s32.totalorder %s14_s7, %s14_s7 }
   0x9   :  { %p1369_p3 = scmp.ne.s32.totalorder %s14_s7, %s1368_s15  ;;  %p1374_p5 = scmp.lt.s32.totalorder %s1368_s15, %s1368_s15 }
   0xb   :  { %p1375_p6 = por %p1374_p5, %p1373_p4 }
   0xd   :  { %p1376_p7 = pnand %p1375_p6, %p1369_p3 }
   0xf   :  { %1379 = shalt.err (!%p1376_p7)
}
  0x10   :  { %s1395_s16 = smov 16   ;;  %s1396_s17 = smov 1  }
  0x11   :  { %19 = dma.hbm_to_vmem [thread:$0]  %s1986_s0, 32, %s14_s7, [#allocation3], %s1395_s16, %s1395_s16, %s1396_s17  }
  0x12   :  { %1390 = dma.done.wait [#allocation3], 32  }
  0x13   :  { %1391 = vsyncadd [#allocation3], 4294967264  ;;  %v26_v0 = vlaneseq  ;;  %v1433_v5 = vld [vmem:[#allocation2] sm:$0x1]  ;;  %vm1988_vm0 = vcmask 1040384   ;;  %v1397_v9 = vmov 0.0|0.0  }
  0x14   :  { %1254 = vmatprep.subr.bf16.mxu0 %v1397_v9  ;;  %1182 = vmatprep.subr.bf16.mxu1 %v1397_v9  ;;  %v1398_v13 = vmov 1.0|1.0   ;;  %v1399_v23 = vmov 0.0   ;;  %s1401_s21 = smov 1.0   ;;  %s1380_s29 = scalar_lea.hbm %s1987_s1, 16 }
  0x15   :  { %v1425_v1 = vshrl.u32 %v26_v0, 7  ;;  %v1427_v2 = vand.u32 127, %v26_v0  ;;  %p1381_p9 = scmp.ne.s32.totalorder %s1987_s1, %s1380_s29  ;;  %p1384_p10 = scmp.lt.u32.totalorder %s1380_s29, %s1987_s1 }
  0x17   :  { %v30_v3 = vmul.u32 128, %v1425_v1  ;;  %v50_v8 = vadd.s32 8, %v1425_v1  ;;  %vm65_vm2 = vcmp.ge.s32.totalorder %v1425_v1, %v1427_v2  ;;  %v1446_v10 = vadd.s32 16, %v1425_v1  ;;  %p1386_p11 = pnand %p1384_p10, %p1381_p9 }
  0x18   :  { %v1449_v11 = vadd.s32 24, %v1425_v1  ;;  %v1492_v15 = vadd.s32 32, %v1425_v1  ;;  %v1495_v16 = vadd.s32 40, %v1425_v1  ;;  %v1518_v18 = vadd.s32 48, %v1425_v1 }
  0x19   :  { %v1431_v4 = vadd.s32 %v30_v3, %v1427_v2  ;;  %vm66_vm3 = vcmp.ge.s32.totalorder %v50_v8, %v1427_v2  ;;  %vm67_vm5 = vcmp.ge.s32.totalorder %v1446_v10, %v1427_v2  ;;  %v1521_v19 = vadd.s32 56, %v1425_v1 }
  0x1a   :  { %vm1457_vm4 = vmpackc.low %vm66_vm3, %vm65_vm2  ;;  %vm68_vm6 = vcmp.ge.s32.totalorder %v1449_v11, %v1427_v2  ;;  %vm69_vm8 = vcmp.ge.s32.totalorder %v1492_v15, %v1427_v2  ;;  %vm70_vm9 = vcmp.ge.s32.totalorder %v1495_v16, %v1427_v2  ;;  %vm1995_vm11 = vcmp.ge.s32.totalorder %v1518_v18, %v1427_v2 }
  0x1b   :  { %vm1989_vm1 = vcmp.lt.s32.totalorder %v1431_v4, 16  ;;  %1256 = vmatpush3.bf16.msk.msra.mxu0 %vm1457_vm4, %v1398_v13  ;;  %1184 = vmatpush3.bf16.msk.msra.mxu1 %vm1457_vm4, %v1398_v13  ;;  %vm1478_vm7 = vmpackc.low %vm68_vm6, %vm67_vm5  ;;  %vm1994_vm12 = vcmp.ge.s32.totalorder %v1521_v19, %v1427_v2  ;;  %v1546_v21 = vadd.s32 64, %v1425_v1  ;;  %v1549_v22 = vadd.s32 72, %v1425_v1 }
  0x1c   :  { %v33_v6 = vsel %vm1989_vm1, %v1433_v5, -3e+38  ;;  %1257 = vmatprep.subr.bf16.mxu0 %v1397_v9  ;;  %1185 = vmatprep.subr.bf16.mxu1 %v1397_v9  ;;  %vm1507_vm10 = vmpackc.low %vm70_vm9, %vm69_vm8  ;;  %v806_v24 = vsel %vm65_vm2, 1.0, %v1399_v23  ;;  %v807_v25 = vsel %vm66_vm3, 1.0, %v1399_v23  ;;  %v1565_v26 = vadd.s32 80, %v1425_v1 }
  0x1d   :  { %v35_v7 = vsel %vm1988_vm0, %v33_v6, -inf  ;;  %vm1535_vm13 = vmpackc.low %vm1994_vm12, %vm1995_vm11  ;;  %vm1991_vm14 = vcmp.ge.s32.totalorder %v1546_v21, %v1427_v2  ;;  %vm1990_vm15 = vcmp.ge.s32.totalorder %v1549_v22, %v1427_v2  ;;  %v1568_v27 = vadd.s32 88, %v1425_v1 }
  0x1e   :  { %36 = vmax.xlane.f32.xlu0 %v35_v7  ;;  %vm1576_vm2 = vmpackc.low %vm1990_vm15, %vm1991_vm14  ;;  %v1581_v29 = vadd.s32 96, %v1425_v1  ;;  %v1584_v30 = vadd.s32 104, %v1425_v1  ;;  %vm1993_vm3 = vcmp.ge.s32.totalorder %v1565_v26, %v1427_v2  ;;  %v1594_v31 = vsub.f32 %v806_v24, %v806_v24 }
  0x1f   :  { %1259 = vmatpush3.bf16.msk.msra.mxu0 %vm1478_vm7, %v1398_v13  ;;  %1187 = vmatpush3.bf16.msk.msra.mxu1 %vm1478_vm7, %v1398_v13  ;;  %v1596_v32 = vsub.f32 %v807_v25, %v807_v25  ;;  %vm1992_vm0 = vcmp.ge.s32.totalorder %v1568_v27, %v1427_v2  ;;  %v1617_v34 = vadd.s32 112, %v1425_v1  ;;  %v1620_v35 = vadd.s32 120, %v1425_v1 }
  0x20   :  { %1260 = vmatprep.subr.bf16.mxu0 %v1397_v9  ;;  %1188 = vmatprep.subr.bf16.mxu1 %v1397_v9  ;;  %vm1608_vm1 = vmpackc.low %vm1992_vm0, %vm1993_vm3  ;;  %vm77_vm15 = vcmp.ge.s32.totalorder %v1581_v29, %v1427_v2  ;;  %vm78_vm14 = vcmp.ge.s32.totalorder %v1584_v30, %v1427_v2  ;;  %v207_v36 = vand.u32 4294901760, %v1594_v31  ;;  %vm1400_vm11 = vmmov 0  }
  0x21   :  { %v214_v37 = vand.u32 4294901760, %v1596_v32  ;;  %vm1637_vm0 = vmpackc.low %vm78_vm14, %vm77_vm15  ;;  %vm79_vm3 = vcmp.ge.s32.totalorder %v1617_v34, %v1427_v2  ;;  %vm80_vm12 = vcmp.ge.s32.totalorder %v1620_v35, %v1427_v2  ;;  %1109 = vmatprep.mubr.msk.f32.mxu0 %vm1400_vm11, %v1399_v23  ;;  %1004 = vmatprep.mubr.msk.f32.mxu1 %vm1400_vm11, %v1399_v23  ;;  %v808_v39 = vsel %vm67_vm5, 1.0, %v1399_v23 }
  0x22   :  { %v809_v40 = vsel %vm68_vm6, 1.0, %v1399_v23  ;;  %v208_v41 = vsub.f32 %v1594_v31, %v207_v36  ;;  %vm1673_vm5 = vmpackc.low %vm80_vm12, %vm79_vm3  ;;  %v1678_v44 = vsub.f32 %v808_v39, %v808_v39  ;;  %v810_v46 = vsel %vm69_vm8, 1.0, %v1399_v23 }
  0x23   :  { %1262 = vmatpush3.bf16.msk.msra.mxu0 %vm1507_vm10, %v1398_v13  ;;  %1190 = vmatpush3.bf16.msk.msra.mxu1 %vm1507_vm10, %v1398_v13  ;;  %v215_v42 = vsub.f32 %v1596_v32, %v214_v37  ;;  %v1680_v45 = vsub.f32 %v809_v40, %v809_v40  ;;  %v811_v47 = vsel %vm70_vm9, 1.0, %v1399_v23  ;;  %v1696_v48 = vpack.c.bf16 %v214_v37, %v207_v36 }
  0x24   :  { %1263 = vmatprep.subr.bf16.mxu0 %v1397_v9  ;;  %1191 = vmatprep.subr.bf16.mxu1 %v1397_v9  ;;  %v209_v49 = vand.u32 4294901760, %v208_v41  ;;  %vm2012_vm6 = vcmp.ge.s32.totalorder %v1518_v18, %v1427_v2  ;;  %vm2013_vm8 = vcmp.ge.s32.totalorder %v1521_v19, %v1427_v2  ;;  %v1708_v53 = vsub.f32 %v810_v46, %v810_v46 }
  0x25   :  { %v216_v50 = vand.u32 4294901760, %v215_v42  ;;  %v812_v51 = vsel %vm2012_vm6, 1.0, %v1399_v23  ;;  %v813_v52 = vsel %vm2013_vm8, 1.0, %v1399_v23  ;;  %v1710_v54 = vsub.f32 %v811_v47, %v811_v47 }
  0x26   :  { %v221_v55 = vand.u32 4294901760, %v1678_v44  ;;  %v228_v56 = vand.u32 4294901760, %v1680_v45  ;;  %v1720_v61 = vsub.f32 %v812_v51, %v812_v51  ;;  %v1722_v62 = vsub.f32 %v813_v52, %v813_v52 }
  0x27   :  { %1265 = vmatpush3.bf16.msk.msra.mxu0 %vm1535_vm13, %v1398_v13  ;;  %1193 = vmatpush3.bf16.msk.msra.mxu1 %vm1535_vm13, %v1398_v13  ;;  %v1714_v57 = vpack.c.bf16 %v216_v50, %v209_v49  ;;  %vm2014_vm9 = vcmp.ge.s32.totalorder %v1546_v21, %v1427_v2  ;;  %vm2015_vm6 = vcmp.ge.s32.totalorder %v1549_v22, %v1427_v2  ;;  %v235_v6 = vand.u32 4294901760, %v1708_v53 }
  0x28   :  { %1266 = vmatprep.subr.bf16.mxu0 %v1397_v9  ;;  %1194 = vmatprep.subr.bf16.mxu1 %v1397_v9  ;;  %v1716_v58 = vpack.c.bf16 %v228_v56, %v221_v55  ;;  %v222_v59 = vsub.f32 %v1678_v44, %v221_v55  ;;  %v229_v60 = vsub.f32 %v1680_v45, %v228_v56  ;;  %v814_v63 = vsel %vm2014_vm9, 1.0, %v1399_v23 }
  0x29   :  { %v815_v0 = vsel %vm2015_vm6, 1.0, %v1399_v23  ;;  %v242_v7 = vand.u32 4294901760, %v1710_v54  ;;  %v236_v11 = vsub.f32 %v1708_v53, %v235_v6  ;;  %v1740_v16 = vsub.f32 %v814_v63, %v814_v63 }
  0x2a   :  { %v223_v1 = vand.u32 4294901760, %v222_v59  ;;  %v230_v3 = vand.u32 4294901760, %v229_v60  ;;  %v1742_v18 = vsub.f32 %v815_v0, %v815_v0  ;;  %vm2016_vm8 = vcmp.ge.s32.totalorder %v1565_v26, %v1427_v2 }
  0x2b   :  { %1268 = vmatpush3.bf16.msk.msra.mxu0 %vm1576_vm2, %v1398_v13  ;;  %1196 = vmatpush3.bf16.msk.msra.mxu1 %vm1576_vm2, %v1398_v13  ;;  %v1736_v10 = vpack.c.bf16 %v242_v7, %v235_v6  ;;  %v243_v15 = vsub.f32 %v1710_v54, %v242_v7  ;;  %v816_v19 = vsel %vm2016_vm8, 1.0, %v1399_v23  ;;  %vm2017_vm9 = vcmp.ge.s32.totalorder %v1568_v27, %v1427_v2 }
  0x2c   :  { %1269 = vmatprep.subr.bf16.mxu0 %v1397_v9  ;;  %1197 = vmatprep.subr.bf16.mxu1 %v1397_v9  ;;  %v1734_v8 = vpack.c.bf16 %v230_v3, %v223_v1  ;;  %v817_v21 = vsel %vm2017_vm9, 1.0, %v1399_v23  ;;  %v237_v22 = vand.u32 4294901760, %v236_v11  ;;  %v249_v25 = vand.u32 4294901760, %v1720_v61 }
  0x2d   :  { %v244_v24 = vand.u32 4294901760, %v243_v15  ;;  %v256_v36 = vand.u32 4294901760, %v1722_v62  ;;  %v1760_v41 = vsub.f32 %v816_v19, %v816_v19  ;;  %v1762_v42 = vsub.f32 %v817_v21, %v817_v21 }
  0x2e   :  { %v250_v40 = vsub.f32 %v1720_v61, %v249_v25  ;;  %v818_v27 = vsel %vm77_vm15, 1.0, %v1399_v23  ;;  %v819_v46 = vsel %vm78_vm14, 1.0, %v1399_v23  ;;  %v263_v50 = vand.u32 4294901760, %v1740_v16 }
  0x2f   :  { %1271 = vmatpush3.bf16.msk.msra.mxu0 %vm1608_vm1, %v1398_v13  ;;  %1199 = vmatpush3.bf16.msk.msra.mxu1 %vm1608_vm1, %v1398_v13  ;;  %v1754_v37 = vpack.c.bf16 %v244_v24, %v237_v22  ;;  %v1756_v39 = vpack.c.bf16 %v256_v36, %v249_v25  ;;  %v257_v26 = vsub.f32 %v1722_v62, %v256_v36  ;;  %v270_v51 = vand.u32 4294901760, %v1742_v18 }
  0x30   :  { %1272 = vmatprep.subr.bf16.mxu0 %v1397_v9  ;;  %1200 = vmatprep.subr.bf16.mxu1 %v1397_v9  ;;  %v251_v47 = vand.u32 4294901760, %v250_v40  ;;  %v264_v56 = vsub.f32 %v1740_v16, %v263_v50  ;;  %v1780_v59 = vsub.f32 %v818_v27, %v818_v27  ;;  %v1782_v60 = vsub.f32 %v819_v46, %v819_v46 }
  0x31   :  { %v258_v49 = vand.u32 4294901760, %v257_v26  ;;  %v1776_v55 = vpack.c.bf16 %v270_v51, %v263_v50  ;;  %v271_v29 = vsub.f32 %v1742_v18, %v270_v51  ;;  %v820_v30 = vsel %vm79_vm3, 1.0, %v1399_v23 }
  0x32   :  { %v821_v63 = vsel %vm80_vm12, 1.0, %v1399_v23  ;;  %v265_v0 = vand.u32 4294901760, %v264_v56  ;;  %v277_v3 = vand.u32 4294901760, %v1760_v41  ;;  %v284_v6 = vand.u32 4294901760, %v1762_v42 }
  0x33   :  { %1274 = vmatpush3.bf16.msk.msra.mxu0 %vm1637_vm0, %v1398_v13  ;;  %1202 = vmatpush3.bf16.msk.msra.mxu1 %vm1637_vm0, %v1398_v13  ;;  %v1774_v52 = vpack.c.bf16 %v258_v49, %v251_v47  ;;  %v272_v1 = vand.u32 4294901760, %v271_v29  ;;  %v1800_v19 = vsub.f32 %v820_v30, %v820_v30  ;;  %v1802_v21 = vsub.f32 %v821_v63, %v821_v63 }
  0x34   :  { %1275 = vmatprep.subr.bf16.mxu0 %v1397_v9  ;;  %1203 = vmatprep.subr.bf16.mxu1 %v1397_v9  ;;  %v1796_v11 = vpack.c.bf16 %v284_v6, %v277_v3  ;;  %v278_v15 = vsub.f32 %v1760_v41, %v277_v3  ;;  %v285_v34 = vsub.f32 %v1762_v42, %v284_v6  ;;  %v291_v22 = vand.u32 4294901760, %v1780_v59 }
  0x35   :  { %v1794_v7 = vpack.c.bf16 %v272_v1, %v265_v0  ;;  %v298_v24 = vand.u32 4294901760, %v1782_v60  ;;  %v305_v47 = vand.u32 4294901760, %v1800_v19  ;;  %v312_v49 = vand.u32 4294901760, %v1802_v21 }
  0x36   :  { %v279_v2 = vand.u32 4294901760, %v278_v15  ;;  %v286_v35 = vand.u32 4294901760, %v285_v34  ;;  %v292_v40 = vsub.f32 %v1780_v59, %v291_v22  ;;  %v1231_v1 = vpack.c.bf16 %v1596_v32, %v1594_v31 }
  0x37   :  { %1277 = vmatpush3.bf16.msk.msra.mxu0 %vm1673_vm5, %v1398_v13  ;;  %1205 = vmatpush3.bf16.msk.msra.mxu1 %vm1673_vm5, %v1398_v13  ;;  %v1808_v36 = vpack.c.bf16 %v298_v24, %v291_v22  ;;  %v299_v26 = vsub.f32 %v1782_v60, %v298_v24  ;;  %v1816_v51 = vpack.c.bf16 %v312_v49, %v305_v47  ;;  %vm2018_vm12 = vcmp.lt.s32.totalorder %v1431_v4, 16 }
  0x38   :  { %1278 = vmatprep.subr.bf16.mxu0 %v1397_v9  ;;  %1206 = vmatprep.subr.bf16.mxu1 %v1397_v9  ;;  %v1806_v25 = vpack.c.bf16 %v286_v35, %v279_v2  ;;  %v293_v27 = vand.u32 4294901760, %v292_v40  ;;  %v306_v56 = vsub.f32 %v1800_v19, %v305_v47  ;;  %v313_v29 = vsub.f32 %v1802_v21, %v312_v49  ;;  %vm2020_vm15 = vmmov %vm2018_vm12 }
  0x39   :  { %v300_v46 = vand.u32 4294901760, %v299_v26  ;;  %v1234_v3 = vpack.c.bf16 %v1680_v45, %v1678_v44  ;;  %v1237_v15 = vpack.c.bf16 %v1710_v54, %v1708_v53  ;;  %v1240_v35 = vpack.c.bf16 %v1722_v62, %v1720_v61 }
  0x3a   :  { %v307_v30 = vand.u32 4294901760, %v306_v56  ;;  %v314_v63 = vand.u32 4294901760, %v313_v29  ;;  %v1243_v40 = vpack.c.bf16 %v1742_v18, %v1740_v16  ;;  %v1249_v47 = vpack.c.bf16 %v1782_v60, %v1780_v59  ;;  %v25_v56 = vld [vmem:[#allocation2 + $0x1] sm:$0x1] }
  0x3b   :  { %v1814_v50 = vpack.c.bf16 %v300_v46, %v293_v27  ;;  %v1246_v46 = vpack.c.bf16 %v1762_v42, %v1760_v41  ;;  %v1252_v49 = vpack.c.bf16 %v1802_v21, %v1800_v19  ;;  %v1840_v29 = vsel %vm2018_vm12, %v25_v56, 0.0 }
  0x3c   :  { %v1820_v0 = vpack.c.bf16 %v314_v63, %v307_v30  ;;  %vm2019_vm14 = vcmask 1040384  }
  0x3d   :  { %v761_v30 = vsel %vm2019_vm14, %v1840_v29, 0.0 }
  0x3e   :  { %762 = vadd.xlane.f32.xlu0 %v761_v30 }
  0xab   :  { %v37_v6 = vpop.xlane.xlu0 %36 }
  0xac   :  { %v38_v34 = vrot.slane %v37_v6, 4 }
  0xae   :  { %v39_v2 = vmax.f32 %v37_v6, %v38_v34 }
  0xb0   :  { %v40_v22 = vrot.slane %v39_v2, 2 }
  0xb2   :  { %v41_v24 = vmax.f32 %v39_v2, %v40_v22 }
  0xb4   :  { %v42_v26 = vrot.slane %v41_v24, 1 }
  0xb6   :  { %v43_v27 = vmax.f32 %v41_v24, %v42_v26 }
  0xb8   :  { %1335 = vpush %v43_v27 }
  0xcb   :  { %v763_v12 = vpop.xlane.xlu0 %762 }
  0xcc   :  { %v764_v14 = vrot.slane %v763_v12, 4 }
  0xce   :  { %v765_v17 = vadd.f32 %v764_v14, %v763_v12 }
  0xd0   :  { %v766_v20 = vrot.slane %v765_v17, 2 }
  0xe9   :  { %s1844_s0 = spop %1335 }
  0xea   :  { %v45_v63 = vstv %s1844_s0 }
  0xeb   :  { %v46_v6 = vsub.f32 %v1433_v5, %v45_v63 }
  0xed   :  { %v47_v34 = vmul.f32 1.442695, %v46_v6 }
  0xef   :  { %1352 = vpow2.f32 %v47_v34 }
  0xf9   :  { %v1353_v2 = vpop.eup %1352 }
  0xfa   :  { %v49_v22 = vsel %vm2020_vm15, %v1353_v2, 0.0 }
  0xfb   :  { %v1852_v24 = vand.u32 4294901760, %v49_v22 }
  0xfd   :  { %v1855_v26 = vsub.f32 %v49_v22, %v1852_v24 }
  0xff   :  { %v196_v27 = vand.u32 4294901760, %v1855_v26 }
 0x101   :  { %1110 = vmatmul.mubr.f32.vlgmr.msra.gmra.mrb[0].mxu0 %v196_v27  ;;  %v197_v56 = vsub.f32 %v1855_v26, %v196_v27 }
 0x102   :  { %1280 = vmatpush3.bf16.msra.mxu0 %v1696_v48  ;;  %1144 = vmatprep.mubr.msk.f32.mxu0 %vm1400_vm11, %v1399_v23 }
 0x103   :  { %1281 = vmatprep.subr.bf16.mxu0 %v1397_v9  ;;  %v198_v30 = vand.u32 4294901760, %v197_v56 }
 0x105   :  { %1005 = vmatmul.mubr.f32.vlgmr.msra.gmra.mrb[0].mxu1 %v198_v30 }
 0x106   :  { %1208 = vmatpush3.bf16.msra.mxu1 %v1714_v57  ;;  %1283 = vmatpush3.bf16.msra.mxu0 %v1716_v58 }
 0x107   :  { %1209 = vmatprep.subr.bf16.mxu1 %v1397_v9  ;;  %1284 = vmatprep.subr.bf16.mxu0 %v1397_v9 }
 0x108   :  { %1039 = vmatprep.mubr.msk.f32.mxu1 %vm1400_vm11, %v1399_v23 }
 0x10a   :  { %1211 = vmatpush3.bf16.msra.mxu1 %v1734_v8  ;;  %1286 = vmatpush3.bf16.msra.mxu0 %v1736_v10 }
 0x10b   :  { %1212 = vmatprep.subr.bf16.mxu1 %v1397_v9  ;;  %1287 = vmatprep.subr.bf16.mxu0 %v1397_v9 }
 0x10e   :  { %1214 = vmatpush3.bf16.msra.mxu1 %v1754_v37  ;;  %1289 = vmatpush3.bf16.msra.mxu0 %v1756_v39 }
 0x10f   :  { %1215 = vmatprep.subr.bf16.mxu1 %v1397_v9  ;;  %1290 = vmatprep.subr.bf16.mxu0 %v1397_v9 }
 0x112   :  { %1217 = vmatpush3.bf16.msra.mxu1 %v1774_v52  ;;  %1292 = vmatpush3.bf16.msra.mxu0 %v1776_v55 }
 0x113   :  { %1218 = vmatprep.subr.bf16.mxu1 %v1397_v9  ;;  %1293 = vmatprep.subr.bf16.mxu0 %v1397_v9 }
 0x116   :  { %1220 = vmatpush3.bf16.msra.mxu1 %v1794_v7  ;;  %1295 = vmatpush3.bf16.msra.mxu0 %v1796_v11 }
 0x117   :  { %1221 = vmatprep.subr.bf16.mxu1 %v1397_v9  ;;  %1296 = vmatprep.subr.bf16.mxu0 %v1397_v9 }
 0x11a   :  { %1223 = vmatpush3.bf16.msra.mxu1 %v1806_v25  ;;  %1298 = vmatpush3.bf16.msra.mxu0 %v1808_v36 }
 0x11b   :  { %1224 = vmatprep.subr.bf16.mxu1 %v1397_v9  ;;  %1299 = vmatprep.subr.bf16.mxu0 %v1397_v9 }
 0x11e   :  { %1226 = vmatpush3.bf16.msra.mxu1 %v1814_v50  ;;  %1301 = vmatpush3.bf16.msra.mxu0 %v1816_v51 }
 0x11f   :  { %1227 = vmatprep.subr.bf16.mxu1 %v1397_v9  ;;  %1302 = vmatprep.subr.bf16.mxu0 %v1397_v9 }
 0x121   :  { %1145 = vmatmul.mubr.f32.vlgmr.msra.gmra.mrb[0].mxu0 %v1852_v24 }
 0x122   :  { %1229 = vmatpush3.bf16.msra.mxu1 %v1820_v0  ;;  %1304 = vmatpush3.bf16.msk.msra.mxu0 %vm1457_vm4, %v1398_v13  ;;  %vm2023_vm4 = vmmov %vm2019_vm14 }
 0x123   :  { %1230 = vmatprep.subr.bf16.mxu1 %v1397_v9  ;;  %1305 = vmatprep.subr.bf16.mxu0 %v1397_v9 }
 0x124   :  { %1179 = vmatprep.mubr.msk.f32.mxu0 %vm1400_vm11, %v1399_v23 }
 0x125   :  { %1040 = vmatmul.mubr.f32.vlgmr.msra.gmra.mrb[0].mxu1 %v1852_v24 }
 0x126   :  { %1232 = vmatpush3.bf16.msra.mxu1 %v1231_v1  ;;  %1307 = vmatpush3.bf16.msk.msra.mxu0 %vm1478_vm7, %v1398_v13 }
 0x127   :  { %1233 = vmatprep.subr.bf16.mxu1 %v1397_v9  ;;  %1308 = vmatprep.subr.bf16.mxu0 %v1397_v9 }
 0x128   :  { %1074 = vmatprep.mubr.msk.f32.mxu1 %vm1400_vm11, %v1399_v23  ;;  %v767_v23 = vadd.f32 %v766_v20, %v765_v17 }
 0x12a   :  { %1235 = vmatpush3.bf16.msra.mxu1 %v1234_v3  ;;  %1310 = vmatpush3.bf16.msk.msra.mxu0 %vm1507_vm10, %v1398_v13  ;;  %v768_v28 = vrot.slane %v767_v23, 1 }
 0x12b   :  { %1236 = vmatprep.subr.bf16.mxu1 %v1397_v9  ;;  %1311 = vmatprep.subr.bf16.mxu0 %v1397_v9 }
 0x12c   :  { %v769_v31 = vadd.f32 %v768_v28, %v767_v23 }
 0x12e   :  { %1238 = vmatpush3.bf16.msra.mxu1 %v1237_v15  ;;  %1313 = vmatpush3.bf16.msk.msra.mxu0 %vm1535_vm13, %v1398_v13  ;;  %1337 = vpush %v769_v31 }
 0x12f   :  { %1239 = vmatprep.subr.bf16.mxu1 %v1397_v9  ;;  %1314 = vmatprep.subr.bf16.mxu0 %v1397_v9 }
 0x132   :  { %1241 = vmatpush3.bf16.msra.mxu1 %v1240_v35  ;;  %1316 = vmatpush3.bf16.msk.msra.mxu0 %vm1576_vm2, %v1398_v13 }
 0x133   :  { %1242 = vmatprep.subr.bf16.mxu1 %v1397_v9  ;;  %1317 = vmatprep.subr.bf16.mxu0 %v1397_v9 }
 0x136   :  { %1244 = vmatpush3.bf16.msra.mxu1 %v1243_v40  ;;  %1319 = vmatpush3.bf16.msk.msra.mxu0 %vm1608_vm1, %v1398_v13 }
 0x137   :  { %1245 = vmatprep.subr.bf16.mxu1 %v1397_v9  ;;  %1320 = vmatprep.subr.bf16.mxu0 %v1397_v9 }
 0x13a   :  { %1247 = vmatpush3.bf16.msra.mxu1 %v1246_v46  ;;  %1322 = vmatpush3.bf16.msk.msra.mxu0 %vm1637_vm0, %v1398_v13  ;;  %vm2021_vm0 = vmmov %vm2018_vm12 }
 0x13b   :  { %1248 = vmatprep.subr.bf16.mxu1 %v1397_v9  ;;  %1323 = vmatprep.subr.bf16.mxu0 %v1397_v9  ;;  %vm2022_vm1 = vmmov %vm2021_vm0 }
 0x13e   :  { %1250 = vmatpush3.bf16.msra.mxu1 %v1249_v47  ;;  %1325 = vmatpush3.bf16.msk.msra.mxu0 %vm1673_vm5, %v1398_v13 }
 0x13f   :  { %1251 = vmatprep.subr.bf16.mxu1 %v1397_v9 }
 0x141   :  { %1180 = vmatmul.mubr.f32.vlgmr.msra.gmra.mrb[0].mxu0 %v1852_v24 }
 0x142   :  { %1253 = vmatpush3.bf16.msra.mxu1 %v1252_v49 }
 0x145   :  { %1075 = vmatmul.mubr.f32.vlgmr.msra.gmra.mrb[0].mxu1 %v1855_v26 }
 0x15f   :  { %s1338_s20 = spop %1337 }
 0x160   :  { %s784_s22 = smax.f32 %s1401_s21, %s1338_s20  ;;  %p783_p8 = scmp.gt.f32.partialorder %s1338_s20, 0.0 }
 0x161   :  { %v785_v61 = vstv %s784_s22 }
 0x214   :  { %v750_v13 = vpop.f32.mrb[0].mxu0 }
 0x215   :  { %v1181_v32 = vpop.f32.mrb[1].mxu0 }
 0x218   :  { %v455_v9 = vpop.f32.mrb[0].mxu1 }
 0x219   :  { %v1326_v33 = vadd.f32 %v750_v13, %v455_v9  ;;  %v1076_v38 = vpop.f32.mrb[1].mxu1 }
 0x21b   :  { %v754_v43 = vsel %vm2021_vm0, %v1326_v33, 1.0 }
 0x21c   :  { %1354 = vlog2.f32 %v754_v43 }
 0x21d   :  { %1356 = vrcp.f32 %v785_v61 }
 0x226   :  { %v1355_v44 = vpop.eup %1354 }
 0x227   :  { %v756_v45 = vmul.f32 0.6931472, %v1355_v44  ;;  %v1357_v39 = vpop.eup %1356 }
 0x229   :  { %v757_v48 = vadd.f32 %v756_v45, %v45_v63 }
 0x22b   :  { %v758_v53 = vsub.f32 %v1433_v5, %v757_v48 }
 0x22d   :  { %v759_v54 = vsel %vm2022_vm1, %v758_v53, 0.0 }
 0x22e   :  { %v771_v57 = vmul.f32 %v1840_v29, %v759_v54 }
 0x230   :  { %v772_v58 = vsel %vm2023_vm4, %v771_v57, 0.0 }
 0x231   :  { %773 = vadd.xlane.f32.xlu1 %v772_v58 }
 0x2be   :  { %v774_v62 = vpop.xlane.xlu1 %773 }
 0x2bf   :  { %v775_v8 = vrot.slane %v774_v62, 4 }
 0x2c1   :  { %v776_v10 = vadd.f32 %v775_v8, %v774_v62 }
 0x2c3   :  { %v777_v16 = vrot.slane %v776_v10, 2 }
 0x2c5   :  { %v778_v18 = vadd.f32 %v777_v16, %v776_v10 }
 0x2c7   :  { %v779_v37 = vrot.slane %v778_v18, 1 }
 0x2c9   :  { %v780_v5 = vadd.f32 %v779_v37, %v778_v18 }
 0x2cb   :  { %1339 = vpush %v780_v5 }
 0x2cc   :  { %1341 = vpush %v1357_v39 }
 0x2fc   :  { %s1340_s23 = spop %1339 }
 0x2fd   :  { %s782_s24 = ssub.f32 0.0, %s1340_s23  ;;  %s1342_s25 = spop %1341 }
 0x2ff   :  { %s788_s26 = smul.f32 %s1342_s25, %s782_s24 }
 0x301   :  { %s2025_s26 = smov (!%p783_p8, %s788_s26), 0.0 }
 0x302   :  { %791 = sst [smem:[#allocation5]] %s2025_s26 }
 0x303   :  { %1389 = shalt.err (!%p1386_p11)
}
 0x304   :  { %s1402_s5 = smov [#allocation5]  }
 0x305   :  { %799 = dma.smem_to_hbm %s1402_s5, 16, %s1987_s1, [#allocation4]  }
 0x306   :  { %1392 = dma.done.wait [#allocation4], 16  }
 0x307   :  { %1393 = vsyncadd [#allocation4], 4294967280 }
 0x308   :  { %803 = sfence }
 0x309   :  { %804 = vsyncpa [#allocation3], 1 }
 0x30a   :  { %805 = vsyncpa [#allocation4], 1 }

</bundles_post_ra>
